<compile_context>
chip_gen: v7x
topology: tpu7x:2x2x1
jax: 0.10.0
libtpu: 0.0.40
codegen_flags: <defaults>
</compile_context>

<pallas_src>
import functools

import jax
import jax.numpy as jnp
from jax import lax
from jax.experimental import pallas as pl
from jax.experimental.pallas import tpu as pltpu

_LN_EPS = 1e-12


def _bert_embeddings_kernel(
    ids_ref,      # SMEM (B*S,)        int32   [scalar prefetch]
    ttids_ref,    # VMEM (tile_s, 1)   int32
    word_hbm,     # HBM  (V, Hp)               [memory_space=pl.ANY]
    pos_ref,      # VMEM (tile_s, Hp)
    type_ref,     # VMEM (T, Hp)
    gamma_ref,    # VMEM (1, Hp)       f32
    beta_ref,     # VMEM (1, Hp)       f32
    out_ref,      # VMEM (tile_s, Hp)
    wbuf,         # VMEM (2*stride, Hp) scratch: double-buffered word rows
    sem,          # DMA  (2,) semaphores: one per buffer slot
    *, S, H):
    tile_s, Hp = out_ref.shape
    stride = ((tile_s + 7) // 8) * 8          # sublane-aligned slot stride
    b = pl.program_id(0)
    s = pl.program_id(1)
    n_s = pl.num_programs(1)
    slot = s & 1

    # ---- word-embedding gather: one row DMA per token, unrolled issue,
    #      single semaphore per buffer slot.
    def issue_tile(s_idx, slot_idx):
        base = b * S + s_idx * tile_s
        off = slot_idx * stride
        for r in range(tile_s):               # static unroll -> packed issues
            tok = ids_ref[base + r]
            pltpu.make_async_copy(
                word_hbm.at[pl.ds(tok, 1), :],
                wbuf.at[pl.ds(off + r, 1), :],
                sem.at[slot_idx],
            ).start()

    # Prime the pipeline at the start of each (per-core) sequential sweep over s.
    @pl.when(s == 0)
    def _():
        issue_tile(0, 0)

    # Prefetch the NEXT tile's word rows into the other slot; their HBM latency
    # overlaps this tile's compute and the pipeline's writeback.
    @pl.when(s + 1 < n_s)
    def _():
        issue_tile(s + 1, 1 - slot)

    # Wait for this tile's rows (issued in the previous grid step, or above).
    woff = slot * stride
    for r in range(tile_s):                   # static unroll
        dst = wbuf.at[pl.ds(woff + r, 1), :]
        pltpu.make_async_copy(dst, dst, sem.at[slot]).wait()

    # ---- token-type embeddings: tiny table resident in VMEM, pure-VPU select.
    tt = ttids_ref[...]                       # (tile_s, 1) int32
    T = type_ref.shape[0]
    if T == 2:
        t0 = type_ref[0:1, :].astype(jnp.float32)
        t1 = type_ref[1:2, :].astype(jnp.float32)
        type_emb = t0 + (tt == 1).astype(jnp.float32) * (t1 - t0)
    else:
        type_emb = jnp.zeros((tile_s, Hp), jnp.float32)
        for t in range(T):
            type_emb = type_emb + (tt == t).astype(jnp.float32) * \
                type_ref[t:t + 1, :].astype(jnp.float32)

    # ---- sum + LayerNorm (f32 statistics).  Padded lanes (>= H) of every
    #      table are zero, so sums over Hp divided by the true H are exact.
    w = wbuf[pl.ds(pl.multiple_of(slot * stride, 8), tile_s), :]
    h = w.astype(jnp.float32) + pos_ref[...].astype(jnp.float32) + type_emb
    inv_h = jnp.float32(1.0 / H)
    mu = jnp.sum(h, axis=-1, keepdims=True) * inv_h
    diff = h - mu
    if Hp != H:
        lane = lax.broadcasted_iota(jnp.int32, (tile_s, Hp), 1)
        diff = jnp.where(lane < H, diff, 0.0)
    var = jnp.sum(diff * diff, axis=-1, keepdims=True) * inv_h
    norm = diff * lax.rsqrt(var + _LN_EPS)
    out = norm * gamma_ref[...] + beta_ref[...]
    out_ref[...] = out.astype(out_ref.dtype)
    # TODO(synk): nn.Dropout is identity in eval/inference; training-mode
    # dropout (pltpu.prng_seed + pltpu.stateful_bernoulli) is not implemented.


def _pick_tile_s(S, want):
    """Largest tile <= want that divides S and is a multiple of 8 (or S itself)."""
    want = min(want, S)
    if want >= S:
        return S
    t = (want // 8) * 8
    while t >= 8:
        if S % t == 0:
            return t
        t -= 8
    return S


def bert_embeddings(input_ids, token_type_ids, params, *, tile_s=None,
                    table_dtype=None, out_dtype=None):
    """Fused BERT embeddings forward (module's default position_ids=arange(S)).

    input_ids, token_type_ids: (B, S) integer arrays. Returns (B, S, H).
    """
    B, S = input_ids.shape
    V, H = params["word_embeddings"].shape
    T = params["token_type_embeddings"].shape[0]
    assert params["position_embeddings"].shape[0] >= S

    if table_dtype is None:
        table_dtype = params["word_embeddings"].dtype   # pass jnp.bfloat16 on v5e
    if out_dtype is None:
        out_dtype = params["word_embeddings"].dtype

    # Lane-dense hidden dim: pad to a multiple of 128 (zeros), slice at the end.
    Hp = ((H + 127) // 128) * 128
    pad = [(0, 0), (0, Hp - H)]

    if tile_s is None:
        tile_s = _pick_tile_s(S, 128)
    assert (tile_s == S) or (S % tile_s == 0 and tile_s % 8 == 0), \
        "tile_s must divide S and be a multiple of 8 (or equal S)"
    stride = ((tile_s + 7) // 8) * 8

    # Clamp ids so an out-of-range token id can never become an OOB HBM DMA.
    ids_flat = jnp.clip(input_ids.reshape(B * S), 0, V - 1).astype(jnp.int32)
    ttids = token_type_ids.reshape(B, S, 1).astype(jnp.int32)

    word_tab = jnp.pad(params["word_embeddings"].astype(table_dtype), pad)        # (V, Hp), HBM
    pos_tab = jnp.pad(params["position_embeddings"][:S].astype(table_dtype), pad)  # (S, Hp)
    type_tab = jnp.pad(params["token_type_embeddings"].astype(table_dtype), pad)   # (T, Hp)
    gamma = jnp.pad(params["ln_weight"].reshape(1, H).astype(jnp.float32), pad)
    beta = jnp.pad(params["ln_bias"].reshape(1, H).astype(jnp.float32), pad)

    grid = (B, S // tile_s)
    kernel = functools.partial(_bert_embeddings_kernel, S=S, H=H)

    out = pl.pallas_call(
        kernel,
        out_shape=jax.ShapeDtypeStruct((B, S, Hp), out_dtype),
        grid_spec=pltpu.PrefetchScalarGridSpec(
            num_scalar_prefetch=1,                                        # token ids -> SMEM
            grid=grid,
            in_specs=[
                pl.BlockSpec((None, tile_s, 1), lambda b, s, ids: (b, s, 0)),   # token-type ids
                pl.BlockSpec(memory_space=pl.ANY),                              # word table (HBM)
                pl.BlockSpec((tile_s, Hp), lambda b, s, ids: (s, 0)),           # position rows
                pl.BlockSpec((T, Hp), lambda b, s, ids: (0, 0)),                # type table (resident)
                pl.BlockSpec((1, Hp), lambda b, s, ids: (0, 0)),                # LN gamma
                pl.BlockSpec((1, Hp), lambda b, s, ids: (0, 0)),                # LN beta
            ],
            out_specs=pl.BlockSpec((None, tile_s, Hp), lambda b, s, ids: (b, s, 0)),
            scratch_shapes=[
                pltpu.VMEM((2 * stride, Hp), word_tab.dtype),  # double-buffered word rows
                pltpu.SemaphoreType.DMA((2,)),                 # one DMA semaphore per slot
            ],
        ),
        compiler_params=pltpu.CompilerParams(
            dimension_semantics=("parallel", "arbitrary")),
    )(ids_flat, ttids, word_tab, pos_tab, type_tab, gamma, beta)

    if Hp != H:
        out = out[..., :H]
    return out


def _reference(input_ids, token_type_ids, params):
    """Pure-JAX reference matching the PyTorch module (eval mode)."""
    S = input_ids.shape[1]
    we = params["word_embeddings"][input_ids]
    pe = params["position_embeddings"][jnp.arange(S)][None, :, :]
    te = params["token_type_embeddings"][token_type_ids]
    h = we + pe + te
    mu = jnp.mean(h, axis=-1, keepdims=True)
    var = jnp.mean(jnp.square(h - mu), axis=-1, keepdims=True)
    h = (h - mu) / jnp.sqrt(var + _LN_EPS)
    return h * params["ln_weight"] + params["ln_bias"]


if __name__ == "__main__":
    # Small shapes implied by the forward: batch=2, seq=8, hidden=32,
    # vocab=256, max_positions=64, type_vocab=2.
    B, S, H = 2, 8, 32
    V, P, T = 256, 64, 2

    key = jax.random.PRNGKey(0)
    ks = jax.random.split(key, 7)

    input_ids = jax.random.randint(ks[0], (B, S), 0, V, dtype=jnp.int32)
    token_type_ids = jax.random.randint(ks[1], (B, S), 0, T, dtype=jnp.int32)

    params = {
        "word_embeddings": jax.random.normal(ks[2], (V, H), jnp.float32) * 0.05,
        "position_embeddings": jax.random.normal(ks[3], (P, H), jnp.float32) * 0.05,
        "token_type_embeddings": jax.random.normal(ks[4], (T, H), jnp.float32) * 0.05,
        "ln_weight": 1.0 + 0.1 * jax.random.normal(ks[5], (H,), jnp.float32),
        "ln_bias": 0.1 * jax.random.normal(ks[6], (H,), jnp.float32),
    }

    out = bert_embeddings(input_ids, token_type_ids, params)
    out = jax.block_until_ready(out)

    ref = _reference(input_ids, token_type_ids, params)
    assert out.shape == (B, S, H)
    assert jnp.allclose(out, ref, atol=1e-4, rtol=1e-4), "mismatch vs reference"

    print("KERNEL_OK")
</pallas_src>

<mosaic_0001>
module attributes {stable_mosaic.version = 11 : i64} {
  func.func @_bert_embeddings_kernel(%arg0: i32, %arg1: i32, %arg2: memref<16xi32, #tpu.memory_space<smem>>, %arg3: memref<1x8x1xi32, #tpu.memory_space<vmem>>, %arg4: memref<256x128xf32, #tpu.memory_space<any>>, %arg5: memref<8x128xf32, #tpu.memory_space<vmem>>, %arg6: memref<2x128xf32, #tpu.memory_space<vmem>>, %arg7: memref<1x128xf32, #tpu.memory_space<vmem>>, %arg8: memref<1x128xf32, #tpu.memory_space<vmem>>, %arg9: memref<1x8x128xf32, #tpu.memory_space<vmem>>, %arg10: memref<16x128xf32, #tpu.memory_space<vmem>>, %arg11: memref<2x!tpu.dma_semaphore, #tpu.memory_space<semaphore_mem>>) attributes {dimension_semantics = [#tpu.dimension_semantics<parallel>, #tpu.dimension_semantics<arbitrary>], iteration_bounds = array<i64: 2, 1>, scalar_prefetch = 1 : i64, scratch_operands = 2 : i64, tpu.core_type = #tpu.core_type<tc>, window_params = [{transform_indices = @transform_0, window_bounds = array<i64: 1, 8, 1>}, {}, {transform_indices = @transform_2, window_bounds = array<i64: 8, 128>}, {pipeline_mode = #tpu.pipeline_mode<synchronous>, transform_indices = @transform_3, window_bounds = array<i64: 2, 128>}, {pipeline_mode = #tpu.pipeline_mode<synchronous>, transform_indices = @transform_4, window_bounds = array<i64: 1, 128>}, {pipeline_mode = #tpu.pipeline_mode<synchronous>, transform_indices = @transform_5, window_bounds = array<i64: 1, 128>}, {transform_indices = @transform_6, window_bounds = array<i64: 1, 8, 128>}]} {
    %c1_i32 = arith.constant 1 : i32
    %0 = arith.andi %arg1, %c1_i32 : i32
    %c0_i32 = arith.constant 0 : i32
    %1 = arith.cmpi eq, %arg1, %c0_i32 : i32
    %2 = arith.extui %1 : i1 to i32
    %c0_i32_0 = arith.constant 0 : i32
    %3 = arith.cmpi ne, %2, %c0_i32_0 : i32
    scf.if %3 {
      %c8_i32_44 = arith.constant 8 : i32
      %100 = arith.muli %arg0, %c8_i32_44 : i32
      %c0_i32_45 = arith.constant 0 : i32
      %101 = arith.addi %100, %c0_i32_45 : i32
      %c0_i32_46 = arith.constant 0 : i32
      %102 = arith.addi %101, %c0_i32_46 : i32
      %103 = arith.index_cast %102 : i32 to index
      %104 = memref.load %arg2[%103] : memref<16xi32, #tpu.memory_space<smem>>
      %c0_i32_47 = arith.constant 0 : i32
      %c0_i32_48 = arith.constant 0 : i32
      %105 = tpu.memref_slice %arg4[%104, %c0_i32_48] : memref<256x128xf32, #tpu.memory_space<any>> -> memref<1x128xf32, #tpu.memory_space<any>>
      %c0_i32_49 = arith.constant 0 : i32
      %c0_i32_50 = arith.constant 0 : i32
      %106 = tpu.memref_slice %arg10[%c0_i32_49, %c0_i32_50] : memref<16x128xf32, #tpu.memory_space<vmem>> -> memref<1x128xf32, #tpu.memory_space<vmem>>
      %107 = tpu.memref_slice %arg11[%c0_i32_47] : memref<2x!tpu.dma_semaphore, #tpu.memory_space<semaphore_mem>> -> memref<1x!tpu.dma_semaphore, #tpu.memory_space<semaphore_mem>>
      %108 = tpu.memref_squeeze %107 : memref<1x!tpu.dma_semaphore, #tpu.memory_space<semaphore_mem>> -> memref<!tpu.dma_semaphore, #tpu.memory_space<semaphore_mem>>
      tpu.enqueue_dma source(%105 : memref<1x128xf32, #tpu.memory_space<any>>) target(%106 : memref<1x128xf32, #tpu.memory_space<vmem>>) target_semaphore(%108 : memref<!tpu.dma_semaphore, #tpu.memory_space<semaphore_mem>>)
      %c1_i32_51 = arith.constant 1 : i32
      %109 = arith.addi %101, %c1_i32_51 : i32
      %110 = arith.index_cast %109 : i32 to index
      %111 = memref.load %arg2[%110] : memref<16xi32, #tpu.memory_space<smem>>
      %c0_i32_52 = arith.constant 0 : i32
      %c0_i32_53 = arith.constant 0 : i32
      %112 = tpu.memref_slice %arg4[%111, %c0_i32_53] : memref<256x128xf32, #tpu.memory_space<any>> -> memref<1x128xf32, #tpu.memory_space<any>>
      %c1_i32_54 = arith.constant 1 : i32
      %c0_i32_55 = arith.constant 0 : i32
      %113 = tpu.memref_slice %arg10[%c1_i32_54, %c0_i32_55] : memref<16x128xf32, #tpu.memory_space<vmem>> -> memref<1x128xf32, #tpu.memory_space<vmem>>
      %114 = tpu.memref_slice %arg11[%c0_i32_52] : memref<2x!tpu.dma_semaphore, #tpu.memory_space<semaphore_mem>> -> memref<1x!tpu.dma_semaphore, #tpu.memory_space<semaphore_mem>>
      %115 = tpu.memref_squeeze %114 : memref<1x!tpu.dma_semaphore, #tpu.memory_space<semaphore_mem>> -> memref<!tpu.dma_semaphore, #tpu.memory_space<semaphore_mem>>
      tpu.enqueue_dma source(%112 : memref<1x128xf32, #tpu.memory_space<any>>) target(%113 : memref<1x128xf32, #tpu.memory_space<vmem>>) target_semaphore(%115 : memref<!tpu.dma_semaphore, #tpu.memory_space<semaphore_mem>>)
      %c2_i32_56 = arith.constant 2 : i32
      %116 = arith.addi %101, %c2_i32_56 : i32
      %117 = arith.index_cast %116 : i32 to index
      %118 = memref.load %arg2[%117] : memref<16xi32, #tpu.memory_space<smem>>
      %c0_i32_57 = arith.constant 0 : i32
      %c0_i32_58 = arith.constant 0 : i32
      %119 = tpu.memref_slice %arg4[%118, %c0_i32_58] : memref<256x128xf32, #tpu.memory_space<any>> -> memref<1x128xf32, #tpu.memory_space<any>>
      %c2_i32_59 = arith.constant 2 : i32
      %c0_i32_60 = arith.constant 0 : i32
      %120 = tpu.memref_slice %arg10[%c2_i32_59, %c0_i32_60] : memref<16x128xf32, #tpu.memory_space<vmem>> -> memref<1x128xf32, #tpu.memory_space<vmem>>
      %121 = tpu.memref_slice %arg11[%c0_i32_57] : memref<2x!tpu.dma_semaphore, #tpu.memory_space<semaphore_mem>> -> memref<1x!tpu.dma_semaphore, #tpu.memory_space<semaphore_mem>>
      %122 = tpu.memref_squeeze %121 : memref<1x!tpu.dma_semaphore, #tpu.memory_space<semaphore_mem>> -> memref<!tpu.dma_semaphore, #tpu.memory_space<semaphore_mem>>
      tpu.enqueue_dma source(%119 : memref<1x128xf32, #tpu.memory_space<any>>) target(%120 : memref<1x128xf32, #tpu.memory_space<vmem>>) target_semaphore(%122 : memref<!tpu.dma_semaphore, #tpu.memory_space<semaphore_mem>>)
      %c3_i32_61 = arith.constant 3 : i32
      %123 = arith.addi %101, %c3_i32_61 : i32
      %124 = arith.index_cast %123 : i32 to index
      %125 = memref.load %arg2[%124] : memref<16xi32, #tpu.memory_space<smem>>
      %c0_i32_62 = arith.constant 0 : i32
      %c0_i32_63 = arith.constant 0 : i32
      %126 = tpu.memref_slice %arg4[%125, %c0_i32_63] : memref<256x128xf32, #tpu.memory_space<any>> -> memref<1x128xf32, #tpu.memory_space<any>>
      %c3_i32_64 = arith.constant 3 : i32
      %c0_i32_65 = arith.constant 0 : i32
      %127 = tpu.memref_slice %arg10[%c3_i32_64, %c0_i32_65] : memref<16x128xf32, #tpu.memory_space<vmem>> -> memref<1x128xf32, #tpu.memory_space<vmem>>
      %128 = tpu.memref_slice %arg11[%c0_i32_62] : memref<2x!tpu.dma_semaphore, #tpu.memory_space<semaphore_mem>> -> memref<1x!tpu.dma_semaphore, #tpu.memory_space<semaphore_mem>>
      %129 = tpu.memref_squeeze %128 : memref<1x!tpu.dma_semaphore, #tpu.memory_space<semaphore_mem>> -> memref<!tpu.dma_semaphore, #tpu.memory_space<semaphore_mem>>
      tpu.enqueue_dma source(%126 : memref<1x128xf32, #tpu.memory_space<any>>) target(%127 : memref<1x128xf32, #tpu.memory_space<vmem>>) target_semaphore(%129 : memref<!tpu.dma_semaphore, #tpu.memory_space<semaphore_mem>>)
      %c4_i32_66 = arith.constant 4 : i32
      %130 = arith.addi %101, %c4_i32_66 : i32
      %131 = arith.index_cast %130 : i32 to index
      %132 = memref.load %arg2[%131] : memref<16xi32, #tpu.memory_space<smem>>
      %c0_i32_67 = arith.constant 0 : i32
      %c0_i32_68 = arith.constant 0 : i32
      %133 = tpu.memref_slice %arg4[%132, %c0_i32_68] : memref<256x128xf32, #tpu.memory_space<any>> -> memref<1x128xf32, #tpu.memory_space<any>>
      %c4_i32_69 = arith.constant 4 : i32
      %c0_i32_70 = arith.constant 0 : i32
      %134 = tpu.memref_slice %arg10[%c4_i32_69, %c0_i32_70] : memref<16x128xf32, #tpu.memory_space<vmem>> -> memref<1x128xf32, #tpu.memory_space<vmem>>
      %135 = tpu.memref_slice %arg11[%c0_i32_67] : memref<2x!tpu.dma_semaphore, #tpu.memory_space<semaphore_mem>> -> memref<1x!tpu.dma_semaphore, #tpu.memory_space<semaphore_mem>>
      %136 = tpu.memref_squeeze %135 : memref<1x!tpu.dma_semaphore, #tpu.memory_space<semaphore_mem>> -> memref<!tpu.dma_semaphore, #tpu.memory_space<semaphore_mem>>
      tpu.enqueue_dma source(%133 : memref<1x128xf32, #tpu.memory_space<any>>) target(%134 : memref<1x128xf32, #tpu.memory_space<vmem>>) target_semaphore(%136 : memref<!tpu.dma_semaphore, #tpu.memory_space<semaphore_mem>>)
      %c5_i32_71 = arith.constant 5 : i32
      %137 = arith.addi %101, %c5_i32_71 : i32
      %138 = arith.index_cast %137 : i32 to index
      %139 = memref.load %arg2[%138] : memref<16xi32, #tpu.memory_space<smem>>
      %c0_i32_72 = arith.constant 0 : i32
      %c0_i32_73 = arith.constant 0 : i32
      %140 = tpu.memref_slice %arg4[%139, %c0_i32_73] : memref<256x128xf32, #tpu.memory_space<any>> -> memref<1x128xf32, #tpu.memory_space<any>>
      %c5_i32_74 = arith.constant 5 : i32
      %c0_i32_75 = arith.constant 0 : i32
      %141 = tpu.memref_slice %arg10[%c5_i32_74, %c0_i32_75] : memref<16x128xf32, #tpu.memory_space<vmem>> -> memref<1x128xf32, #tpu.memory_space<vmem>>
      %142 = tpu.memref_slice %arg11[%c0_i32_72] : memref<2x!tpu.dma_semaphore, #tpu.memory_space<semaphore_mem>> -> memref<1x!tpu.dma_semaphore, #tpu.memory_space<semaphore_mem>>
      %143 = tpu.memref_squeeze %142 : memref<1x!tpu.dma_semaphore, #tpu.memory_space<semaphore_mem>> -> memref<!tpu.dma_semaphore, #tpu.memory_space<semaphore_mem>>
      tpu.enqueue_dma source(%140 : memref<1x128xf32, #tpu.memory_space<any>>) target(%141 : memref<1x128xf32, #tpu.memory_space<vmem>>) target_semaphore(%143 : memref<!tpu.dma_semaphore, #tpu.memory_space<semaphore_mem>>)
      %c6_i32_76 = arith.constant 6 : i32
      %144 = arith.addi %101, %c6_i32_76 : i32
      %145 = arith.index_cast %144 : i32 to index
      %146 = memref.load %arg2[%145] : memref<16xi32, #tpu.memory_space<smem>>
      %c0_i32_77 = arith.constant 0 : i32
      %c0_i32_78 = arith.constant 0 : i32
      %147 = tpu.memref_slice %arg4[%146, %c0_i32_78] : memref<256x128xf32, #tpu.memory_space<any>> -> memref<1x128xf32, #tpu.memory_space<any>>
      %c6_i32_79 = arith.constant 6 : i32
      %c0_i32_80 = arith.constant 0 : i32
      %148 = tpu.memref_slice %arg10[%c6_i32_79, %c0_i32_80] : memref<16x128xf32, #tpu.memory_space<vmem>> -> memref<1x128xf32, #tpu.memory_space<vmem>>
      %149 = tpu.memref_slice %arg11[%c0_i32_77] : memref<2x!tpu.dma_semaphore, #tpu.memory_space<semaphore_mem>> -> memref<1x!tpu.dma_semaphore, #tpu.memory_space<semaphore_mem>>
      %150 = tpu.memref_squeeze %149 : memref<1x!tpu.dma_semaphore, #tpu.memory_space<semaphore_mem>> -> memref<!tpu.dma_semaphore, #tpu.memory_space<semaphore_mem>>
      tpu.enqueue_dma source(%147 : memref<1x128xf32, #tpu.memory_space<any>>) target(%148 : memref<1x128xf32, #tpu.memory_space<vmem>>) target_semaphore(%150 : memref<!tpu.dma_semaphore, #tpu.memory_space<semaphore_mem>>)
      %c7_i32_81 = arith.constant 7 : i32
      %151 = arith.addi %101, %c7_i32_81 : i32
      %152 = arith.index_cast %151 : i32 to index
      %153 = memref.load %arg2[%152] : memref<16xi32, #tpu.memory_space<smem>>
      %c0_i32_82 = arith.constant 0 : i32
      %c0_i32_83 = arith.constant 0 : i32
      %154 = tpu.memref_slice %arg4[%153, %c0_i32_83] : memref<256x128xf32, #tpu.memory_space<any>> -> memref<1x128xf32, #tpu.memory_space<any>>
      %c7_i32_84 = arith.constant 7 : i32
      %c0_i32_85 = arith.constant 0 : i32
      %155 = tpu.memref_slice %arg10[%c7_i32_84, %c0_i32_85] : memref<16x128xf32, #tpu.memory_space<vmem>> -> memref<1x128xf32, #tpu.memory_space<vmem>>
      %156 = tpu.memref_slice %arg11[%c0_i32_82] : memref<2x!tpu.dma_semaphore, #tpu.memory_space<semaphore_mem>> -> memref<1x!tpu.dma_semaphore, #tpu.memory_space<semaphore_mem>>
      %157 = tpu.memref_squeeze %156 : memref<1x!tpu.dma_semaphore, #tpu.memory_space<semaphore_mem>> -> memref<!tpu.dma_semaphore, #tpu.memory_space<semaphore_mem>>
      tpu.enqueue_dma source(%154 : memref<1x128xf32, #tpu.memory_space<any>>) target(%155 : memref<1x128xf32, #tpu.memory_space<vmem>>) target_semaphore(%157 : memref<!tpu.dma_semaphore, #tpu.memory_space<semaphore_mem>>)
    } else {
    }
    %c1_i32_1 = arith.constant 1 : i32
    %4 = arith.addi %arg1, %c1_i32_1 : i32
    %c1_i32_2 = arith.constant 1 : i32
    %5 = arith.cmpi slt, %4, %c1_i32_2 : i32
    %6 = arith.extui %5 : i1 to i32
    %c0_i32_3 = arith.constant 0 : i32
    %7 = arith.cmpi ne, %6, %c0_i32_3 : i32
    scf.if %7 {
      %c1_i32_44 = arith.constant 1 : i32
      %100 = arith.addi %arg1, %c1_i32_44 : i32
      %c1_i32_45 = arith.constant 1 : i32
      %101 = arith.subi %c1_i32_45, %0 : i32
      %c8_i32_46 = arith.constant 8 : i32
      %102 = arith.muli %arg0, %c8_i32_46 : i32
      %c8_i32_47 = arith.constant 8 : i32
      %103 = arith.muli %100, %c8_i32_47 : i32
      %104 = arith.addi %102, %103 : i32
      %c8_i32_48 = arith.constant 8 : i32
      %105 = arith.muli %101, %c8_i32_48 : i32
      %c0_i32_49 = arith.constant 0 : i32
      %106 = arith.addi %104, %c0_i32_49 : i32
      %107 = arith.index_cast %106 : i32 to index
      %108 = memref.load %arg2[%107] : memref<16xi32, #tpu.memory_space<smem>>
      %c0_i32_50 = arith.constant 0 : i32
      %109 = arith.addi %105, %c0_i32_50 : i32
      %c0_i32_51 = arith.constant 0 : i32
      %110 = tpu.memref_slice %arg4[%108, %c0_i32_51] : memref<256x128xf32, #tpu.memory_space<any>> -> memref<1x128xf32, #tpu.memory_space<any>>
      %c0_i32_52 = arith.constant 0 : i32
      %111 = tpu.memref_slice %arg10[%109, %c0_i32_52] : memref<16x128xf32, #tpu.memory_space<vmem>> -> memref<1x128xf32, #tpu.memory_space<vmem>>
      %112 = tpu.memref_slice %arg11[%101] : memref<2x!tpu.dma_semaphore, #tpu.memory_space<semaphore_mem>> -> memref<1x!tpu.dma_semaphore, #tpu.memory_space<semaphore_mem>>
      %113 = tpu.memref_squeeze %112 : memref<1x!tpu.dma_semaphore, #tpu.memory_space<semaphore_mem>> -> memref<!tpu.dma_semaphore, #tpu.memory_space<semaphore_mem>>
      tpu.enqueue_dma source(%110 : memref<1x128xf32, #tpu.memory_space<any>>) target(%111 : memref<1x128xf32, #tpu.memory_space<vmem>>) target_semaphore(%113 : memref<!tpu.dma_semaphore, #tpu.memory_space<semaphore_mem>>)
      %c1_i32_53 = arith.constant 1 : i32
      %114 = arith.addi %104, %c1_i32_53 : i32
      %115 = arith.index_cast %114 : i32 to index
      %116 = memref.load %arg2[%115] : memref<16xi32, #tpu.memory_space<smem>>
      %c1_i32_54 = arith.constant 1 : i32
      %117 = arith.addi %105, %c1_i32_54 : i32
      %c0_i32_55 = arith.constant 0 : i32
      %118 = tpu.memref_slice %arg4[%116, %c0_i32_55] : memref<256x128xf32, #tpu.memory_space<any>> -> memref<1x128xf32, #tpu.memory_space<any>>
      %c0_i32_56 = arith.constant 0 : i32
      %119 = tpu.memref_slice %arg10[%117, %c0_i32_56] : memref<16x128xf32, #tpu.memory_space<vmem>> -> memref<1x128xf32, #tpu.memory_space<vmem>>
      %120 = tpu.memref_slice %arg11[%101] : memref<2x!tpu.dma_semaphore, #tpu.memory_space<semaphore_mem>> -> memref<1x!tpu.dma_semaphore, #tpu.memory_space<semaphore_mem>>
      %121 = tpu.memref_squeeze %120 : memref<1x!tpu.dma_semaphore, #tpu.memory_space<semaphore_mem>> -> memref<!tpu.dma_semaphore, #tpu.memory_space<semaphore_mem>>
      tpu.enqueue_dma source(%118 : memref<1x128xf32, #tpu.memory_space<any>>) target(%119 : memref<1x128xf32, #tpu.memory_space<vmem>>) target_semaphore(%121 : memref<!tpu.dma_semaphore, #tpu.memory_space<semaphore_mem>>)
      %c2_i32_57 = arith.constant 2 : i32
      %122 = arith.addi %104, %c2_i32_57 : i32
      %123 = arith.index_cast %122 : i32 to index
      %124 = memref.load %arg2[%123] : memref<16xi32, #tpu.memory_space<smem>>
      %c2_i32_58 = arith.constant 2 : i32
      %125 = arith.addi %105, %c2_i32_58 : i32
      %c0_i32_59 = arith.constant 0 : i32
      %126 = tpu.memref_slice %arg4[%124, %c0_i32_59] : memref<256x128xf32, #tpu.memory_space<any>> -> memref<1x128xf32, #tpu.memory_space<any>>
      %c0_i32_60 = arith.constant 0 : i32
      %127 = tpu.memref_slice %arg10[%125, %c0_i32_60] : memref<16x128xf32, #tpu.memory_space<vmem>> -> memref<1x128xf32, #tpu.memory_space<vmem>>
      %128 = tpu.memref_slice %arg11[%101] : memref<2x!tpu.dma_semaphore, #tpu.memory_space<semaphore_mem>> -> memref<1x!tpu.dma_semaphore, #tpu.memory_space<semaphore_mem>>
      %129 = tpu.memref_squeeze %128 : memref<1x!tpu.dma_semaphore, #tpu.memory_space<semaphore_mem>> -> memref<!tpu.dma_semaphore, #tpu.memory_space<semaphore_mem>>
      tpu.enqueue_dma source(%126 : memref<1x128xf32, #tpu.memory_space<any>>) target(%127 : memref<1x128xf32, #tpu.memory_space<vmem>>) target_semaphore(%129 : memref<!tpu.dma_semaphore, #tpu.memory_space<semaphore_mem>>)
      %c3_i32_61 = arith.constant 3 : i32
      %130 = arith.addi %104, %c3_i32_61 : i32
      %131 = arith.index_cast %130 : i32 to index
      %132 = memref.load %arg2[%131] : memref<16xi32, #tpu.memory_space<smem>>
      %c3_i32_62 = arith.constant 3 : i32
      %133 = arith.addi %105, %c3_i32_62 : i32
      %c0_i32_63 = arith.constant 0 : i32
      %134 = tpu.memref_slice %arg4[%132, %c0_i32_63] : memref<256x128xf32, #tpu.memory_space<any>> -> memref<1x128xf32, #tpu.memory_space<any>>
      %c0_i32_64 = arith.constant 0 : i32
      %135 = tpu.memref_slice %arg10[%133, %c0_i32_64] : memref<16x128xf32, #tpu.memory_space<vmem>> -> memref<1x128xf32, #tpu.memory_space<vmem>>
      %136 = tpu.memref_slice %arg11[%101] : memref<2x!tpu.dma_semaphore, #tpu.memory_space<semaphore_mem>> -> memref<1x!tpu.dma_semaphore, #tpu.memory_space<semaphore_mem>>
      %137 = tpu.memref_squeeze %136 : memref<1x!tpu.dma_semaphore, #tpu.memory_space<semaphore_mem>> -> memref<!tpu.dma_semaphore, #tpu.memory_space<semaphore_mem>>
      tpu.enqueue_dma source(%134 : memref<1x128xf32, #tpu.memory_space<any>>) target(%135 : memref<1x128xf32, #tpu.memory_space<vmem>>) target_semaphore(%137 : memref<!tpu.dma_semaphore, #tpu.memory_space<semaphore_mem>>)
      %c4_i32_65 = arith.constant 4 : i32
      %138 = arith.addi %104, %c4_i32_65 : i32
      %139 = arith.index_cast %138 : i32 to index
      %140 = memref.load %arg2[%139] : memref<16xi32, #tpu.memory_space<smem>>
      %c4_i32_66 = arith.constant 4 : i32
      %141 = arith.addi %105, %c4_i32_66 : i32
      %c0_i32_67 = arith.constant 0 : i32
      %142 = tpu.memref_slice %arg4[%140, %c0_i32_67] : memref<256x128xf32, #tpu.memory_space<any>> -> memref<1x128xf32, #tpu.memory_space<any>>
      %c0_i32_68 = arith.constant 0 : i32
      %143 = tpu.memref_slice %arg10[%141, %c0_i32_68] : memref<16x128xf32, #tpu.memory_space<vmem>> -> memref<1x128xf32, #tpu.memory_space<vmem>>
      %144 = tpu.memref_slice %arg11[%101] : memref<2x!tpu.dma_semaphore, #tpu.memory_space<semaphore_mem>> -> memref<1x!tpu.dma_semaphore, #tpu.memory_space<semaphore_mem>>
      %145 = tpu.memref_squeeze %144 : memref<1x!tpu.dma_semaphore, #tpu.memory_space<semaphore_mem>> -> memref<!tpu.dma_semaphore, #tpu.memory_space<semaphore_mem>>
      tpu.enqueue_dma source(%142 : memref<1x128xf32, #tpu.memory_space<any>>) target(%143 : memref<1x128xf32, #tpu.memory_space<vmem>>) target_semaphore(%145 : memref<!tpu.dma_semaphore, #tpu.memory_space<semaphore_mem>>)
      %c5_i32_69 = arith.constant 5 : i32
      %146 = arith.addi %104, %c5_i32_69 : i32
      %147 = arith.index_cast %146 : i32 to index
      %148 = memref.load %arg2[%147] : memref<16xi32, #tpu.memory_space<smem>>
      %c5_i32_70 = arith.constant 5 : i32
      %149 = arith.addi %105, %c5_i32_70 : i32
      %c0_i32_71 = arith.constant 0 : i32
      %150 = tpu.memref_slice %arg4[%148, %c0_i32_71] : memref<256x128xf32, #tpu.memory_space<any>> -> memref<1x128xf32, #tpu.memory_space<any>>
      %c0_i32_72 = arith.constant 0 : i32
      %151 = tpu.memref_slice %arg10[%149, %c0_i32_72] : memref<16x128xf32, #tpu.memory_space<vmem>> -> memref<1x128xf32, #tpu.memory_space<vmem>>
      %152 = tpu.memref_slice %arg11[%101] : memref<2x!tpu.dma_semaphore, #tpu.memory_space<semaphore_mem>> -> memref<1x!tpu.dma_semaphore, #tpu.memory_space<semaphore_mem>>
      %153 = tpu.memref_squeeze %152 : memref<1x!tpu.dma_semaphore, #tpu.memory_space<semaphore_mem>> -> memref<!tpu.dma_semaphore, #tpu.memory_space<semaphore_mem>>
      tpu.enqueue_dma source(%150 : memref<1x128xf32, #tpu.memory_space<any>>) target(%151 : memref<1x128xf32, #tpu.memory_space<vmem>>) target_semaphore(%153 : memref<!tpu.dma_semaphore, #tpu.memory_space<semaphore_mem>>)
      %c6_i32_73 = arith.constant 6 : i32
      %154 = arith.addi %104, %c6_i32_73 : i32
      %155 = arith.index_cast %154 : i32 to index
      %156 = memref.load %arg2[%155] : memref<16xi32, #tpu.memory_space<smem>>
      %c6_i32_74 = arith.constant 6 : i32
      %157 = arith.addi %105, %c6_i32_74 : i32
      %c0_i32_75 = arith.constant 0 : i32
      %158 = tpu.memref_slice %arg4[%156, %c0_i32_75] : memref<256x128xf32, #tpu.memory_space<any>> -> memref<1x128xf32, #tpu.memory_space<any>>
      %c0_i32_76 = arith.constant 0 : i32
      %159 = tpu.memref_slice %arg10[%157, %c0_i32_76] : memref<16x128xf32, #tpu.memory_space<vmem>> -> memref<1x128xf32, #tpu.memory_space<vmem>>
      %160 = tpu.memref_slice %arg11[%101] : memref<2x!tpu.dma_semaphore, #tpu.memory_space<semaphore_mem>> -> memref<1x!tpu.dma_semaphore, #tpu.memory_space<semaphore_mem>>
      %161 = tpu.memref_squeeze %160 : memref<1x!tpu.dma_semaphore, #tpu.memory_space<semaphore_mem>> -> memref<!tpu.dma_semaphore, #tpu.memory_space<semaphore_mem>>
      tpu.enqueue_dma source(%158 : memref<1x128xf32, #tpu.memory_space<any>>) target(%159 : memref<1x128xf32, #tpu.memory_space<vmem>>) target_semaphore(%161 : memref<!tpu.dma_semaphore, #tpu.memory_space<semaphore_mem>>)
      %c7_i32_77 = arith.constant 7 : i32
      %162 = arith.addi %104, %c7_i32_77 : i32
      %163 = arith.index_cast %162 : i32 to index
      %164 = memref.load %arg2[%163] : memref<16xi32, #tpu.memory_space<smem>>
      %c7_i32_78 = arith.constant 7 : i32
      %165 = arith.addi %105, %c7_i32_78 : i32
      %c0_i32_79 = arith.constant 0 : i32
      %166 = tpu.memref_slice %arg4[%164, %c0_i32_79] : memref<256x128xf32, #tpu.memory_space<any>> -> memref<1x128xf32, #tpu.memory_space<any>>
      %c0_i32_80 = arith.constant 0 : i32
      %167 = tpu.memref_slice %arg10[%165, %c0_i32_80] : memref<16x128xf32, #tpu.memory_space<vmem>> -> memref<1x128xf32, #tpu.memory_space<vmem>>
      %168 = tpu.memref_slice %arg11[%101] : memref<2x!tpu.dma_semaphore, #tpu.memory_space<semaphore_mem>> -> memref<1x!tpu.dma_semaphore, #tpu.memory_space<semaphore_mem>>
      %169 = tpu.memref_squeeze %168 : memref<1x!tpu.dma_semaphore, #tpu.memory_space<semaphore_mem>> -> memref<!tpu.dma_semaphore, #tpu.memory_space<semaphore_mem>>
      tpu.enqueue_dma source(%166 : memref<1x128xf32, #tpu.memory_space<any>>) target(%167 : memref<1x128xf32, #tpu.memory_space<vmem>>) target_semaphore(%169 : memref<!tpu.dma_semaphore, #tpu.memory_space<semaphore_mem>>)
    } else {
    }
    %c8_i32 = arith.constant 8 : i32
    %8 = arith.muli %0, %c8_i32 : i32
    %c0_i32_4 = arith.constant 0 : i32
    %9 = arith.addi %8, %c0_i32_4 : i32
    %c0_i32_5 = arith.constant 0 : i32
    %10 = tpu.memref_slice %arg10[%9, %c0_i32_5] : memref<16x128xf32, #tpu.memory_space<vmem>> -> memref<1x128xf32, #tpu.memory_space<vmem>>
    %c0_i32_6 = arith.constant 0 : i32
    %11 = tpu.memref_slice %arg10[%9, %c0_i32_6] : memref<16x128xf32, #tpu.memory_space<vmem>> -> memref<1x128xf32, #tpu.memory_space<vmem>>
    %12 = tpu.memref_slice %arg11[%0] : memref<2x!tpu.dma_semaphore, #tpu.memory_space<semaphore_mem>> -> memref<1x!tpu.dma_semaphore, #tpu.memory_space<semaphore_mem>>
    %13 = tpu.memref_squeeze %12 : memref<1x!tpu.dma_semaphore, #tpu.memory_space<semaphore_mem>> -> memref<!tpu.dma_semaphore, #tpu.memory_space<semaphore_mem>>
    tpu.wait_dma2 semaphore(%13 : memref<!tpu.dma_semaphore, #tpu.memory_space<semaphore_mem>>) src(%10 : memref<1x128xf32, #tpu.memory_space<vmem>>) dst(%11 : memref<1x128xf32, #tpu.memory_space<vmem>>)
    %c1_i32_7 = arith.constant 1 : i32
    %14 = arith.addi %8, %c1_i32_7 : i32
    %c0_i32_8 = arith.constant 0 : i32
    %15 = tpu.memref_slice %arg10[%14, %c0_i32_8] : memref<16x128xf32, #tpu.memory_space<vmem>> -> memref<1x128xf32, #tpu.memory_space<vmem>>
    %c0_i32_9 = arith.constant 0 : i32
    %16 = tpu.memref_slice %arg10[%14, %c0_i32_9] : memref<16x128xf32, #tpu.memory_space<vmem>> -> memref<1x128xf32, #tpu.memory_space<vmem>>
    %17 = tpu.memref_slice %arg11[%0] : memref<2x!tpu.dma_semaphore, #tpu.memory_space<semaphore_mem>> -> memref<1x!tpu.dma_semaphore, #tpu.memory_space<semaphore_mem>>
    %18 = tpu.memref_squeeze %17 : memref<1x!tpu.dma_semaphore, #tpu.memory_space<semaphore_mem>> -> memref<!tpu.dma_semaphore, #tpu.memory_space<semaphore_mem>>
    tpu.wait_dma2 semaphore(%18 : memref<!tpu.dma_semaphore, #tpu.memory_space<semaphore_mem>>) src(%15 : memref<1x128xf32, #tpu.memory_space<vmem>>) dst(%16 : memref<1x128xf32, #tpu.memory_space<vmem>>)
    %c2_i32 = arith.constant 2 : i32
    %19 = arith.addi %8, %c2_i32 : i32
    %c0_i32_10 = arith.constant 0 : i32
    %20 = tpu.memref_slice %arg10[%19, %c0_i32_10] : memref<16x128xf32, #tpu.memory_space<vmem>> -> memref<1x128xf32, #tpu.memory_space<vmem>>
    %c0_i32_11 = arith.constant 0 : i32
    %21 = tpu.memref_slice %arg10[%19, %c0_i32_11] : memref<16x128xf32, #tpu.memory_space<vmem>> -> memref<1x128xf32, #tpu.memory_space<vmem>>
    %22 = tpu.memref_slice %arg11[%0] : memref<2x!tpu.dma_semaphore, #tpu.memory_space<semaphore_mem>> -> memref<1x!tpu.dma_semaphore, #tpu.memory_space<semaphore_mem>>
    %23 = tpu.memref_squeeze %22 : memref<1x!tpu.dma_semaphore, #tpu.memory_space<semaphore_mem>> -> memref<!tpu.dma_semaphore, #tpu.memory_space<semaphore_mem>>
    tpu.wait_dma2 semaphore(%23 : memref<!tpu.dma_semaphore, #tpu.memory_space<semaphore_mem>>) src(%20 : memref<1x128xf32, #tpu.memory_space<vmem>>) dst(%21 : memref<1x128xf32, #tpu.memory_space<vmem>>)
    %c3_i32 = arith.constant 3 : i32
    %24 = arith.addi %8, %c3_i32 : i32
    %c0_i32_12 = arith.constant 0 : i32
    %25 = tpu.memref_slice %arg10[%24, %c0_i32_12] : memref<16x128xf32, #tpu.memory_space<vmem>> -> memref<1x128xf32, #tpu.memory_space<vmem>>
    %c0_i32_13 = arith.constant 0 : i32
    %26 = tpu.memref_slice %arg10[%24, %c0_i32_13] : memref<16x128xf32, #tpu.memory_space<vmem>> -> memref<1x128xf32, #tpu.memory_space<vmem>>
    %27 = tpu.memref_slice %arg11[%0] : memref<2x!tpu.dma_semaphore, #tpu.memory_space<semaphore_mem>> -> memref<1x!tpu.dma_semaphore, #tpu.memory_space<semaphore_mem>>
    %28 = tpu.memref_squeeze %27 : memref<1x!tpu.dma_semaphore, #tpu.memory_space<semaphore_mem>> -> memref<!tpu.dma_semaphore, #tpu.memory_space<semaphore_mem>>
    tpu.wait_dma2 semaphore(%28 : memref<!tpu.dma_semaphore, #tpu.memory_space<semaphore_mem>>) src(%25 : memref<1x128xf32, #tpu.memory_space<vmem>>) dst(%26 : memref<1x128xf32, #tpu.memory_space<vmem>>)
    %c4_i32 = arith.constant 4 : i32
    %29 = arith.addi %8, %c4_i32 : i32
    %c0_i32_14 = arith.constant 0 : i32
    %30 = tpu.memref_slice %arg10[%29, %c0_i32_14] : memref<16x128xf32, #tpu.memory_space<vmem>> -> memref<1x128xf32, #tpu.memory_space<vmem>>
    %c0_i32_15 = arith.constant 0 : i32
    %31 = tpu.memref_slice %arg10[%29, %c0_i32_15] : memref<16x128xf32, #tpu.memory_space<vmem>> -> memref<1x128xf32, #tpu.memory_space<vmem>>
    %32 = tpu.memref_slice %arg11[%0] : memref<2x!tpu.dma_semaphore, #tpu.memory_space<semaphore_mem>> -> memref<1x!tpu.dma_semaphore, #tpu.memory_space<semaphore_mem>>
    %33 = tpu.memref_squeeze %32 : memref<1x!tpu.dma_semaphore, #tpu.memory_space<semaphore_mem>> -> memref<!tpu.dma_semaphore, #tpu.memory_space<semaphore_mem>>
    tpu.wait_dma2 semaphore(%33 : memref<!tpu.dma_semaphore, #tpu.memory_space<semaphore_mem>>) src(%30 : memref<1x128xf32, #tpu.memory_space<vmem>>) dst(%31 : memref<1x128xf32, #tpu.memory_space<vmem>>)
    %c5_i32 = arith.constant 5 : i32
    %34 = arith.addi %8, %c5_i32 : i32
    %c0_i32_16 = arith.constant 0 : i32
    %35 = tpu.memref_slice %arg10[%34, %c0_i32_16] : memref<16x128xf32, #tpu.memory_space<vmem>> -> memref<1x128xf32, #tpu.memory_space<vmem>>
    %c0_i32_17 = arith.constant 0 : i32
    %36 = tpu.memref_slice %arg10[%34, %c0_i32_17] : memref<16x128xf32, #tpu.memory_space<vmem>> -> memref<1x128xf32, #tpu.memory_space<vmem>>
    %37 = tpu.memref_slice %arg11[%0] : memref<2x!tpu.dma_semaphore, #tpu.memory_space<semaphore_mem>> -> memref<1x!tpu.dma_semaphore, #tpu.memory_space<semaphore_mem>>
    %38 = tpu.memref_squeeze %37 : memref<1x!tpu.dma_semaphore, #tpu.memory_space<semaphore_mem>> -> memref<!tpu.dma_semaphore, #tpu.memory_space<semaphore_mem>>
    tpu.wait_dma2 semaphore(%38 : memref<!tpu.dma_semaphore, #tpu.memory_space<semaphore_mem>>) src(%35 : memref<1x128xf32, #tpu.memory_space<vmem>>) dst(%36 : memref<1x128xf32, #tpu.memory_space<vmem>>)
    %c6_i32 = arith.constant 6 : i32
    %39 = arith.addi %8, %c6_i32 : i32
    %c0_i32_18 = arith.constant 0 : i32
    %40 = tpu.memref_slice %arg10[%39, %c0_i32_18] : memref<16x128xf32, #tpu.memory_space<vmem>> -> memref<1x128xf32, #tpu.memory_space<vmem>>
    %c0_i32_19 = arith.constant 0 : i32
    %41 = tpu.memref_slice %arg10[%39, %c0_i32_19] : memref<16x128xf32, #tpu.memory_space<vmem>> -> memref<1x128xf32, #tpu.memory_space<vmem>>
    %42 = tpu.memref_slice %arg11[%0] : memref<2x!tpu.dma_semaphore, #tpu.memory_space<semaphore_mem>> -> memref<1x!tpu.dma_semaphore, #tpu.memory_space<semaphore_mem>>
    %43 = tpu.memref_squeeze %42 : memref<1x!tpu.dma_semaphore, #tpu.memory_space<semaphore_mem>> -> memref<!tpu.dma_semaphore, #tpu.memory_space<semaphore_mem>>
    tpu.wait_dma2 semaphore(%43 : memref<!tpu.dma_semaphore, #tpu.memory_space<semaphore_mem>>) src(%40 : memref<1x128xf32, #tpu.memory_space<vmem>>) dst(%41 : memref<1x128xf32, #tpu.memory_space<vmem>>)
    %c7_i32 = arith.constant 7 : i32
    %44 = arith.addi %8, %c7_i32 : i32
    %c0_i32_20 = arith.constant 0 : i32
    %45 = tpu.memref_slice %arg10[%44, %c0_i32_20] : memref<16x128xf32, #tpu.memory_space<vmem>> -> memref<1x128xf32, #tpu.memory_space<vmem>>
    %c0_i32_21 = arith.constant 0 : i32
    %46 = tpu.memref_slice %arg10[%44, %c0_i32_21] : memref<16x128xf32, #tpu.memory_space<vmem>> -> memref<1x128xf32, #tpu.memory_space<vmem>>
    %47 = tpu.memref_slice %arg11[%0] : memref<2x!tpu.dma_semaphore, #tpu.memory_space<semaphore_mem>> -> memref<1x!tpu.dma_semaphore, #tpu.memory_space<semaphore_mem>>
    %48 = tpu.memref_squeeze %47 : memref<1x!tpu.dma_semaphore, #tpu.memory_space<semaphore_mem>> -> memref<!tpu.dma_semaphore, #tpu.memory_space<semaphore_mem>>
    tpu.wait_dma2 semaphore(%48 : memref<!tpu.dma_semaphore, #tpu.memory_space<semaphore_mem>>) src(%45 : memref<1x128xf32, #tpu.memory_space<vmem>>) dst(%46 : memref<1x128xf32, #tpu.memory_space<vmem>>)
    %c0 = arith.constant 0 : index
    %c0_22 = arith.constant 0 : index
    %c0_23 = arith.constant 0 : index
    %49 = vector.load %arg3[%c0, %c0_22, %c0_23] : memref<1x8x1xi32, #tpu.memory_space<vmem>>, vector<1x8x1xi32>
    %50 = vector.shape_cast %49 : vector<1x8x1xi32> to vector<8x1xi32>
    %c0_24 = arith.constant 0 : index
    %c0_25 = arith.constant 0 : index
    %51 = vector.load %arg6[%c0_24, %c0_25] : memref<2x128xf32, #tpu.memory_space<vmem>>, vector<1x128xf32>
    %c1 = arith.constant 1 : index
    %c0_26 = arith.constant 0 : index
    %52 = vector.load %arg6[%c1, %c0_26] : memref<2x128xf32, #tpu.memory_space<vmem>>, vector<1x128xf32>
    %c1_i32_27 = arith.constant 1 : i32
    %53 = vector.broadcast %c1_i32_27 : i32 to vector<8x1xi32>
    %54 = arith.cmpi eq, %50, %53 : vector<8x1xi32>
    %55 = arith.extui %54 : vector<8x1xi1> to vector<8x1xi32>
    %56 = arith.sitofp %55 : vector<8x1xi32> to vector<8x1xf32>
    %57 = arith.subf %52, %51 : vector<1x128xf32>
    %58 = vector.broadcast %56 : vector<8x1xf32> to vector<8x128xf32>
    %59 = vector.broadcast %57 : vector<1x128xf32> to vector<8x128xf32>
    %60 = arith.mulf %58, %59 : vector<8x128xf32>
    %61 = vector.broadcast %51 : vector<1x128xf32> to vector<8x128xf32>
    %62 = arith.addf %61, %60 : vector<8x128xf32>
    %c8_i32_28 = arith.constant 8 : i32
    %63 = arith.muli %0, %c8_i32_28 : i32
    %64 = tpu.assume_multiple %63, 8 : i32
    %65 = arith.index_cast %64 : i32 to index
    %c0_29 = arith.constant 0 : index
    %66 = vector.load %arg10[%65, %c0_29] : memref<16x128xf32, #tpu.memory_space<vmem>>, vector<8x128xf32>
    %c0_30 = arith.constant 0 : index
    %c0_31 = arith.constant 0 : index
    %67 = vector.load %arg5[%c0_30, %c0_31] : memref<8x128xf32, #tpu.memory_space<vmem>>, vector<8x128xf32>
    %68 = arith.addf %66, %67 : vector<8x128xf32>
    %69 = arith.addf %68, %62 : vector<8x128xf32>
    %cst = arith.constant dense<0.000000e+00> : vector<8xf32>
    %70 = vector.multi_reduction <add>, %69, %cst [1] : vector<8x128xf32> to vector<8xf32>
    %71 = vector.shape_cast %70 : vector<8xf32> to vector<8x1xf32>
    %cst_32 = arith.constant 3.125000e-02 : f32
    %72 = vector.broadcast %cst_32 : f32 to vector<8x1xf32>
    %73 = arith.mulf %71, %72 : vector<8x1xf32>
    %74 = vector.broadcast %73 : vector<8x1xf32> to vector<8x128xf32>
    %75 = arith.subf %69, %74 : vector<8x128xf32>
    %76 = tpu.iota {dimensions = array<i32: 1>} : vector<8x128xi32>
    %c32_i32 = arith.constant 32 : i32
    %77 = vector.broadcast %c32_i32 : i32 to vector<8x128xi32>
    %78 = arith.cmpi slt, %76, %77 : vector<8x128xi32>
    %cst_33 = arith.constant 0.000000e+00 : f32
    %79 = vector.broadcast %cst_33 : f32 to vector<8x128xf32>
    %80 = arith.select %78, %75, %79 : vector<8x128xi1>, vector<8x128xf32>
    %81 = arith.mulf %80, %80 : vector<8x128xf32>
    %cst_34 = arith.constant dense<0.000000e+00> : vector<8xf32>
    %82 = vector.multi_reduction <add>, %81, %cst_34 [1] : vector<8x128xf32> to vector<8xf32>
    %83 = vector.shape_cast %82 : vector<8xf32> to vector<8x1xf32>
    %cst_35 = arith.constant 3.125000e-02 : f32
    %84 = vector.broadcast %cst_35 : f32 to vector<8x1xf32>
    %85 = arith.mulf %83, %84 : vector<8x1xf32>
    %cst_36 = arith.constant 9.99999996E-13 : f32
    %86 = vector.broadcast %cst_36 : f32 to vector<8x1xf32>
    %87 = arith.addf %85, %86 : vector<8x1xf32>
    %88 = math.rsqrt %87 : vector<8x1xf32>
    %89 = vector.broadcast %88 : vector<8x1xf32> to vector<8x128xf32>
    %90 = arith.mulf %80, %89 : vector<8x128xf32>
    %c0_37 = arith.constant 0 : index
    %c0_38 = arith.constant 0 : index
    %91 = vector.load %arg7[%c0_37, %c0_38] : memref<1x128xf32, #tpu.memory_space<vmem>>, vector<1x128xf32>
    %92 = vector.broadcast %91 : vector<1x128xf32> to vector<8x128xf32>
    %93 = arith.mulf %90, %92 : vector<8x128xf32>
    %c0_39 = arith.constant 0 : index
    %c0_40 = arith.constant 0 : index
    %94 = vector.load %arg8[%c0_39, %c0_40] : memref<1x128xf32, #tpu.memory_space<vmem>>, vector<1x128xf32>
    %95 = vector.broadcast %94 : vector<1x128xf32> to vector<8x128xf32>
    %96 = arith.addf %93, %95 : vector<8x128xf32>
    %c0_41 = arith.constant 0 : index
    %c0_42 = arith.constant 0 : index
    %c0_43 = arith.constant 0 : index
    %97 = vector.load %arg9[%c0_41, %c0_42, %c0_43] : memref<1x8x128xf32, #tpu.memory_space<vmem>>, vector<1x8x128xf32>
    %98 = vector.shape_cast %97 : vector<1x8x128xf32> to vector<8x128xf32>
    %99 = vector.shape_cast %96 : vector<8x128xf32> to vector<1x8x128xf32>
    tpu.vector_store %arg9[%c0_41, %c0_42, %c0_43], %99 {strides = array<i32>} : memref<1x8x128xf32, #tpu.memory_space<vmem>>, vector<1x8x128xf32>,
    return
  }
  func.func @transform_0(%arg0: i32, %arg1: i32, %arg2: memref<16xi32, #tpu.memory_space<smem>>) -> (i32, i32, i32) {
    %c0_i32 = arith.constant 0 : i32
    %c0_i32_0 = arith.constant 0 : i32
    return %arg0, %arg1, %c0_i32 : i32, i32, i32
  }
  func.func @transform_2(%arg0: i32, %arg1: i32, %arg2: memref<16xi32, #tpu.memory_space<smem>>) -> (i32, i32) {
    %c0_i32 = arith.constant 0 : i32
    %c0_i32_0 = arith.constant 0 : i32
    return %arg1, %c0_i32 : i32, i32
  }
  func.func @transform_3(%arg0: i32, %arg1: i32, %arg2: memref<16xi32, #tpu.memory_space<smem>>) -> (i32, i32) {
    %c0_i32 = arith.constant 0 : i32
    %c0_i32_0 = arith.constant 0 : i32
    %c0_i32_1 = arith.constant 0 : i32
    return %c0_i32, %c0_i32_0 : i32, i32
  }
  func.func @transform_4(%arg0: i32, %arg1: i32, %arg2: memref<16xi32, #tpu.memory_space<smem>>) -> (i32, i32) {
    %c0_i32 = arith.constant 0 : i32
    %c0_i32_0 = arith.constant 0 : i32
    %c0_i32_1 = arith.constant 0 : i32
    return %c0_i32, %c0_i32_0 : i32, i32
  }
  func.func @transform_5(%arg0: i32, %arg1: i32, %arg2: memref<16xi32, #tpu.memory_space<smem>>) -> (i32, i32) {
    %c0_i32 = arith.constant 0 : i32
    %c0_i32_0 = arith.constant 0 : i32
    %c0_i32_1 = arith.constant 0 : i32
    return %c0_i32, %c0_i32_0 : i32, i32
  }
  func.func @transform_6(%arg0: i32, %arg1: i32, %arg2: memref<16xi32, #tpu.memory_space<smem>>) -> (i32, i32, i32) {
    %c0_i32 = arith.constant 0 : i32
    %c0_i32_0 = arith.constant 0 : i32
    return %arg0, %arg1, %c0_i32 : i32, i32, i32
  }
}

</mosaic_0001>

<bundles_post_ra>
// kernel: tpu_custom_call.1
= control target key start
LH: loop header
LB: loop body
LE: loop exit
PB: predicated region body
PF: predicated region fallthrough
CT: control target
= control target key end

     0   :  { %s1535_s0 = inlined_call_operand.vmem [shape: s32[16], index: 0, kind: input, shape index: {}]   ;;  %s1536_s1 = inlined_call_operand.vmem [shape: s32[2,8,1], index: 1, kind: input, shape index: {}]   ;;  %s1537_s2 = inlined_call_operand.hbm [shape: f32[256,128], index: 2, kind: input, shape index: {}]   ;;  %s1538_s3 = inlined_call_operand.vmem [shape: f32[8,128], index: 3, kind: input, shape index: {}]   ;;  %s1539_s4 = inlined_call_operand.vmem [shape: f32[2,128], index: 4, kind: input, shape index: {}]   ;;  %s1540_s5 = inlined_call_operand.vmem [shape: f32[1,128], index: 5, kind: input, shape index: {}]   ;;  %s1541_s6 = inlined_call_operand.vmem [shape: f32[1,128], index: 6, kind: input, shape index: {}]   ;;  %s1542_s7 = inlined_call_operand.hbm [shape: f32[2,8,128], index: 7, kind: output, shape index: {}]  }
   0x1   :  { %1552 = sst [smem:[#allocation52_spill]] %s1536_s1  ;;  %s12_s26 = sshll.u32 %s1535_s0, 4  ;;  %s13_s26 = int_to_ptr.vmem [resolvable:$true] %s12_s26 }
   0x2   :  { %1553 = sst [smem:[#allocation53_spill]] %s1542_s7  ;;  %s909_s27 = scalar_lea.vmem %s13_s26, 16 }
   0x3   :  { %p910_p0 = scmp.ne.s32.totalorder %s13_s26, %s909_s27  ;;  %p914_p1 = scmp.lt.s32.totalorder %s13_s26, %s13_s26 }
   0x4   :  { %p915_p2 = scmp.lt.s32.totalorder %s909_s27, %s909_s27 }
   0x6   :  { %p916_p3 = por %p915_p2, %p914_p1 }
   0x8   :  { %p917_p4 = pnand %p916_p3, %p910_p0 }
   0xa   :  { %920 = shalt.err (!%p917_p4)  }
   0xb   :  { %s1197_s28 = smov [#allocation5]  }
   0xc   :  { %15 = dma.vmem_to_smem %s13_s26, 16, %s1197_s28, [#allocation4] }
   0xd   :  { %1165 = dma.done.wait [#allocation4], 16 }
   0xe   :  { %1166 = vsyncadd [#allocation4], 4294967280 }
   0xf   :  { %17 = sfence }
  0x10   :  { %18 = vsyncpa [#allocation7], 0 }
  0x11   :  { %20 = vsyncpa [#allocation7 + $0x1], 0  ;;  %s1252_s29 = smov 0   ;;  %s1254_s30 = smov 0  }
  0x12   :  { %s1256_s0 = smov 0   ;;  %s1258_s8 = smov 0  }
  0x13   :  { %s1260_s9 = smov 0   ;;  %s1262_s10 = smov 0  }
  0x14 LB: > { %1554 = sst [smem:[#allocation45_spill]] %s1175_s29  ;;  %s798_s11 = sadd.s32 4294967295, %s1195_s10   ;;  %s1195_s10 = sphi %s1262_s10, %s26_s10   ;;  %s1191_s9 = sphi %s1260_s9, %s1572_s9   ;;  %s1187_s8 = sphi %s1258_s8, %s1571_s8   ;;  %s1183_s0 = sphi %s1256_s0, %s1575_s0   ;;  %s1179_s30 = sphi %s1254_s30, %s1574_s30   ;;  %s1175_s29 = sphi %s1252_s29, %s1573_s29  }
  0x15   : > { %1555 = sst [smem:[#allocation46_spill]] %s1183_s0  ;;  %s799_s12 = sadd.s32 4294967294, %s1195_s10  }
  0x16   : > { %1556 = sst [smem:[#allocation47_spill]] %s1191_s9  ;;  %s38_s13 = sadd.s32 1, %s1191_s9 }
  0x17   : > { %1557 = sst [smem:[#allocation48_spill]] %s1195_s10  ;;  %s164_s14 = sadd.s32 1, %s1183_s0 }
  0x18   : > { %p40_p5 = scmp.ge.s32.totalorder %s38_s13, 2  ;;  %p174_p6 = scmp.ne.s32.totalorder %s1183_s0, %s1179_s30 }
  0x19   : > { %p175_p7 = scmp.eq.s32.totalorder %s798_s11, 1  ;;  %p180_p8 = scmp.ne.s32.totalorder %s1179_s30, %s1175_s29 }
  0x1a   : > { %s1577_s13 = smov (%p40_p5, %s38_s13), 0  ;;  %p181_p10 = scmp.eq.s32.totalorder %s799_s12, 1 }
  0x1b   : > { %1558 = sst [smem:[#allocation49_spill]] %s1577_s13  ;;  %p1292_p9 = por %p175_p7, %p174_p6 }
  0x1c   : > { %s159_s16 = ssub.s32 %s1191_s9, %s1577_s13  ;;  %p803_p11 = scmp.ge.s32.totalorder %s1195_s10, 1 }
  0x1d   : > { %p162_p12 = scmp.eq.s32.totalorder %s159_s16, 0  ;;  %p1299_p13 = por %p181_p10, %p180_p8 }
  0x1e   : > { %p225_p0 = scmp.lt.s32.totalorder %s1195_s10, 3 }
  0x1f   : > { %s1560_s17 = scalar_select %p1299_p13, 1, 0 }
  0x20   : > { %s1305_s18 = scalar_select %p162_p12, %s1183_s0, %s164_s14  }
  0x21   : > { %1561 = sst [smem:[#allocation50_spill]] %s1560_s17  ;;  %p226_p1 = pnand %p803_p11, %p225_p0 }
  0x22   : > { %1562 = sst [smem:[#allocation51_spill]] %s1305_s18  ;;  %s1543_s19 = sand.u32 (!%p226_p1), 1, %s1179_s30  }
  0x23   : > { %229 = sbr.rel (%p226_p1) target bundleno = 687 (0x2af), region = 40  ;;  %p259_p2 = scmp.lt.s32.totalorder (!%p226_p1), %s1187_s8, 1 }
  0x24   : > { %s1311_s20 = sshll.u32 (!%p226_p1), %s1543_s19, 3  ;;  %s1314_s21 = sshll.u32 (!%p226_p1), %s1187_s8, 3 }
  0x25   : > { %s276_s22 = sld [smem:[#allocation5 + %s1314_s21]] (!%p226_p1)  ;;  %s290_s24 = sadd.s32 (!%p226_p1), 1, %s1314_s21 }
  0x26   : > { %s1198_s26 = smov (!%p226_p1), [#allocation2]   ;;  %s1563_s1 = sld [smem:[#allocation52_spill]] (!%p226_p1) }
  0x27   : > { %s286_s27 = sshll.u32 (!%p226_p1), %s1198_s26, 4  ;;  %s1326_s14 = sld [smem:[#allocation5 + %s290_s24]] (!%p226_p1)  ;;  %s1324_s27 = int_to_ptr.vmem [resolvable:$true] %s286_s27 }
  0x28   : > { %s1199_s19 = smov (!%p226_p1), [#allocation2 + $0x1]  }
  0x29   : > { %s302_s13 = sshll.u32 (!%p226_p1), %s1199_s19, 4  ;;  %s1331_s13 = int_to_ptr.vmem [resolvable:$true] %s302_s13 }
  0x2a   : > { %s260_s23 = scalar_select %p259_p2, %s1187_s8, 1 }
  0x2b   : > { %s807_s16 = sshll.u32 %s276_s22, 4 }
  0x2c   : > { %s805_s25 = sshll.u32 %s260_s23, 3  ;;  %s278_s0 = scalar_lea.hbm %s1537_s2, %s807_s16 }
  0x2d   : > { %s1322_s12 = scalar_lea.vmem %s1563_s1, %s805_s25  ;;  %s921_s23 = scalar_lea.hbm %s278_s0, 16 }
  0x2e   : > { %p922_p3 = scmp.ne.s32.totalorder %s278_s0, %s921_s23  ;;  %s1336_s25 = scalar_lea.hbm %s1537_s2, 4096 }
  0x2f   : > { %p924_p4 = scmp.lt.u32.totalorder %s278_s0, %s1537_s2  ;;  %p925_p5 = scmp.lt.u32.totalorder %s1336_s25, %s921_s23 }
  0x30   : > { %p927_p7 = scmp.lt.u32.totalorder %s921_s23, %s278_s0 }
  0x31   : > { %p926_p6 = por %p925_p5, %p924_p4 }
  0x33   : > { %p928_p8 = por %p927_p7, %p926_p6 }
  0x35   : > { %p929_p10 = pnand %p928_p8, %p922_p3 }
  0x37   : > { %932 = shalt.err (!%p929_p10)  }
  0x38   : > { %s933_s9 = scalar_lea.vmem %s1324_s27, 16  ;;  %s1345_s17 = scalar_lea.vmem %s1324_s27, 256 }
  0x39   : > { %p934_p11 = scmp.ne.s32.totalorder %s1324_s27, %s933_s9  ;;  %p938_p12 = scmp.lt.s32.totalorder %s1324_s27, %s1324_s27 }
  0x3a   : > { %p939_p0 = scmp.lt.s32.totalorder %s1345_s17, %s933_s9 }
  0x3c   : > { %p940_p1 = por %p939_p0, %p938_p12 }
  0x3e   : > { %p941_p2 = pnand %p940_p1, %p934_p11 }
  0x40   : > { %944 = shalt.err (!%p941_p2)  }
  0x41   : > { %289 = dma.hbm_to_vmem [thread:$0]  %s278_s0, 16, %s1324_s27, [#allocation3] }
  0x42   : > { %s306_s18 = sadd.s32 2, %s1314_s21  ;;  %s1200_s22 = smov [#allocation2 + $0x2]  }
  0x43   : > { %s1352_s19 = sld [smem:[#allocation5 + %s306_s18]]  ;;  %s318_s24 = sshll.u32 %s1200_s22, 4  ;;  %s1355_s24 = int_to_ptr.vmem [resolvable:$true] %s318_s24 }
  0x44   : > { %s808_s16 = sshll.u32 %s1326_s14, 4  ;;  %s322_s11 = sadd.s32 3, %s1314_s21 }
  0x45   : > { %s293_s28 = scalar_lea.hbm %s1537_s2, %s808_s16 }
  0x46   : > { %s945_s9 = scalar_lea.hbm %s293_s28, 16  ;;  %p948_p4 = scmp.lt.u32.totalorder %s293_s28, %s1537_s2 }
  0x47   : > { %p946_p3 = scmp.ne.s32.totalorder %s293_s28, %s945_s9  ;;  %p949_p5 = scmp.lt.u32.totalorder %s1336_s25, %s945_s9 }
  0x48   : > { %p951_p7 = scmp.lt.u32.totalorder %s945_s9, %s293_s28 }
  0x49   : > { %p950_p6 = por %p949_p5, %p948_p4 }
  0x4b   : > { %p952_p8 = por %p951_p7, %p950_p6 }
  0x4d   : > { %p953_p10 = pnand %p952_p8, %p946_p3 }
  0x4f   : > { %956 = shalt.err (!%p953_p10)  }
  0x50   : > { %s957_s0 = scalar_lea.vmem %s1331_s13, 16  ;;  %p962_p12 = scmp.lt.s32.totalorder %s1331_s13, %s1324_s27 }
  0x51   : > { %p958_p11 = scmp.ne.s32.totalorder %s1331_s13, %s957_s0  ;;  %p963_p0 = scmp.lt.s32.totalorder %s1345_s17, %s957_s0 }
  0x53   : > { %p964_p1 = por %p963_p0, %p962_p12 }
  0x55   : > { %p965_p2 = pnand %p964_p1, %p958_p11 }
  0x57   : > { %968 = shalt.err (!%p965_p2)  }
  0x58   : > { %305 = dma.hbm_to_vmem [thread:$0]  %s293_s28, 16, %s1331_s13, [#allocation3] }
  0x59   : > { %s1371_s1 = sld [smem:[#allocation5 + %s322_s11]]  ;;  %s1201_s29 = smov [#allocation2 + $0x3]  }
  0x5a   : > { %s334_s14 = sshll.u32 %s1201_s29, 4  ;;  %s338_s18 = sadd.s32 4, %s1314_s21  ;;  %s1375_s14 = int_to_ptr.vmem [resolvable:$true] %s334_s14 }
  0x5b   : > { %s809_s22 = sshll.u32 %s1352_s19, 4  ;;  %s1380_s9 = sld [smem:[#allocation5 + %s338_s18]] }
  0x5c   : > { %s309_s26 = scalar_lea.hbm %s1537_s2, %s809_s22 }
  0x5d   : > { %s969_s0 = scalar_lea.hbm %s309_s26, 16  ;;  %p972_p4 = scmp.lt.u32.totalorder %s309_s26, %s1537_s2 }
  0x5e   : > { %p970_p3 = scmp.ne.s32.totalorder %s309_s26, %s969_s0  ;;  %p973_p5 = scmp.lt.u32.totalorder %s1336_s25, %s969_s0 }
  0x5f   : > { %p975_p7 = scmp.lt.u32.totalorder %s969_s0, %s309_s26 }
  0x60   : > { %p974_p6 = por %p973_p5, %p972_p4 }
  0x62   : > { %p976_p8 = por %p975_p7, %p974_p6 }
  0x64   : > { %p977_p10 = pnand %p976_p8, %p970_p3 }
  0x66   : > { %980 = shalt.err (!%p977_p10)  }
  0x67   : > { %s981_s13 = scalar_lea.vmem %s1355_s24, 16  ;;  %p986_p12 = scmp.lt.s32.totalorder %s1355_s24, %s1324_s27 }
  0x68   : > { %p982_p11 = scmp.ne.s32.totalorder %s1355_s24, %s981_s13  ;;  %p987_p0 = scmp.lt.s32.totalorder %s1345_s17, %s981_s13 }
  0x6a   : > { %p988_p1 = por %p987_p0, %p986_p12 }
  0x6c   : > { %p989_p2 = pnand %p988_p1, %p982_p11 }
  0x6e   : > { %992 = shalt.err (!%p989_p2)  }
  0x6f   : > { %321 = dma.hbm_to_vmem [thread:$0]  %s309_s26, 16, %s1355_s24, [#allocation3] }
  0x70   : > { %s354_s7 = sadd.s32 5, %s1314_s21  ;;  %s810_s10 = sshll.u32 %s1371_s1, 4 }
  0x71   : > { %s1202_s19 = smov [#allocation2 + $0x4]   ;;  %s325_s18 = scalar_lea.hbm %s1537_s2, %s810_s10 }
  0x72   : > { %s350_s28 = sshll.u32 %s1202_s19, 4  ;;  %s993_s22 = scalar_lea.hbm %s325_s18, 16  ;;  %s1397_s28 = int_to_ptr.vmem [resolvable:$true] %s350_s28 }
  0x73   : > { %p994_p3 = scmp.ne.s32.totalorder %s325_s18, %s993_s22  ;;  %p996_p4 = scmp.lt.u32.totalorder %s325_s18, %s1537_s2 }
  0x74   : > { %p997_p5 = scmp.lt.u32.totalorder %s1336_s25, %s993_s22  ;;  %p999_p7 = scmp.lt.u32.totalorder %s993_s22, %s325_s18 }
  0x76   : > { %p998_p6 = por %p997_p5, %p996_p4 }
  0x78   : > { %p1000_p8 = por %p999_p7, %p998_p6 }
  0x7a   : > { %p1001_p10 = pnand %p1000_p8, %p994_p3 }
  0x7c   : > { %1004 = shalt.err (!%p1001_p10)  }
  0x7d   : > { %s1005_s24 = scalar_lea.vmem %s1375_s14, 16  ;;  %p1010_p12 = scmp.lt.s32.totalorder %s1375_s14, %s1324_s27 }
  0x7e   : > { %p1006_p11 = scmp.ne.s32.totalorder %s1375_s14, %s1005_s24  ;;  %p1011_p0 = scmp.lt.s32.totalorder %s1345_s17, %s1005_s24 }
  0x80   : > { %p1012_p1 = por %p1011_p0, %p1010_p12 }
  0x82   : > { %p1013_p2 = pnand %p1012_p1, %p1006_p11 }
  0x84   : > { %1016 = shalt.err (!%p1013_p2)  }
  0x85   : > { %337 = dma.hbm_to_vmem [thread:$0]  %s325_s18, 16, %s1375_s14, [#allocation3] }
  0x86   : > { %s811_s1 = sshll.u32 %s1380_s9, 4  ;;  %s1410_s26 = sld [smem:[#allocation5 + %s354_s7]] }
  0x87   : > { %s341_s10 = scalar_lea.hbm %s1537_s2, %s811_s1 }
  0x88   : > { %s1017_s19 = scalar_lea.hbm %s341_s10, 16  ;;  %p1020_p4 = scmp.lt.u32.totalorder %s341_s10, %s1537_s2 }
  0x89   : > { %p1018_p3 = scmp.ne.s32.totalorder %s341_s10, %s1017_s19  ;;  %p1021_p5 = scmp.lt.u32.totalorder %s1336_s25, %s1017_s19 }
  0x8a   : > { %p1023_p7 = scmp.lt.u32.totalorder %s1017_s19, %s341_s10 }
  0x8b   : > { %p1022_p6 = por %p1021_p5, %p1020_p4 }
  0x8d   : > { %p1024_p8 = por %p1023_p7, %p1022_p6 }
  0x8f   : > { %p1025_p10 = pnand %p1024_p8, %p1018_p3 }
  0x91   : > { %1028 = shalt.err (!%p1025_p10)  }
  0x92   : > { %s1029_s14 = scalar_lea.vmem %s1397_s28, 16  ;;  %p1034_p12 = scmp.lt.s32.totalorder %s1397_s28, %s1324_s27 }
  0x93   : > { %p1030_p11 = scmp.ne.s32.totalorder %s1397_s28, %s1029_s14  ;;  %p1035_p0 = scmp.lt.s32.totalorder %s1345_s17, %s1029_s14 }
  0x95   : > { %p1036_p1 = por %p1035_p0, %p1034_p12 }
  0x97   : > { %p1037_p2 = pnand %p1036_p1, %p1030_p11 }
  0x99   : > { %1040 = shalt.err (!%p1037_p2)  }
  0x9a   : > { %353 = dma.hbm_to_vmem [thread:$0]  %s341_s10, 16, %s1397_s28, [#allocation3] }
  0x9b   : > { %s1203_s9 = smov [#allocation2 + $0x5]   ;;  %s370_s18 = sadd.s32 6, %s1314_s21 }
  0x9c   : > { %s366_s7 = sshll.u32 %s1203_s9, 4  ;;  %s371_s22 = sld [smem:[#allocation5 + %s370_s18]]  ;;  %s367_s7 = int_to_ptr.vmem [resolvable:$true] %s366_s7 }
  0x9d   : > { %s386_s16 = sadd.s32 7, %s1314_s21  ;;  %s812_s23 = sshll.u32 %s1410_s26, 4 }
  0x9e   : > { %s1204_s24 = smov [#allocation2 + $0x6]   ;;  %s357_s19 = scalar_lea.hbm %s1537_s2, %s812_s23 }
  0x9f   : > { %s382_s1 = sshll.u32 %s1204_s24, 4  ;;  %s1041_s11 = scalar_lea.hbm %s357_s19, 16  ;;  %s1431_s1 = int_to_ptr.vmem [resolvable:$true] %s382_s1 }
  0xa0   : > { %p1042_p3 = scmp.ne.s32.totalorder %s357_s19, %s1041_s11  ;;  %p1044_p4 = scmp.lt.u32.totalorder %s357_s19, %s1537_s2 }
  0xa1   : > { %p1045_p5 = scmp.lt.u32.totalorder %s1336_s25, %s1041_s11  ;;  %p1047_p7 = scmp.lt.u32.totalorder %s1041_s11, %s357_s19 }
  0xa3   : > { %p1046_p6 = por %p1045_p5, %p1044_p4 }
  0xa5   : > { %p1048_p8 = por %p1047_p7, %p1046_p6 }
  0xa7   : > { %p1049_p10 = pnand %p1048_p8, %p1042_p3 }
  0xa9   : > { %1052 = shalt.err (!%p1049_p10)  }
  0xaa   : > { %s1053_s21 = scalar_lea.vmem %s367_s7, 16  ;;  %p1058_p12 = scmp.lt.s32.totalorder %s367_s7, %s1324_s27 }
  0xab   : > { %p1054_p11 = scmp.ne.s32.totalorder %s367_s7, %s1053_s21  ;;  %p1059_p0 = scmp.lt.s32.totalorder %s1345_s17, %s1053_s21 }
  0xad   : > { %p1060_p1 = por %p1059_p0, %p1058_p12 }
  0xaf   : > { %p1061_p2 = pnand %p1060_p1, %p1054_p11 }
  0xb1   : > { %1064 = shalt.err (!%p1061_p2)  }
  0xb2   : > { %369 = dma.hbm_to_vmem [thread:$0]  %s357_s19, 16, %s367_s7, [#allocation3] }
  0xb3   : > { %s387_s28 = sld [smem:[#allocation5 + %s386_s16]]  ;;  %s813_s26 = sshll.u32 %s371_s22, 4 }
  0xb4   : > { %s373_s18 = scalar_lea.hbm %s1537_s2, %s813_s26  ;;  %s1205_s23 = smov [#allocation2 + $0x7]  }
  0xb5   : > { %s398_s24 = sshll.u32 %s1205_s23, 4  ;;  %s1065_s0 = scalar_lea.hbm %s373_s18, 16  ;;  %s399_s24 = int_to_ptr.vmem [resolvable:$true] %s398_s24 }
  0xb6   : > { %p1066_p3 = scmp.ne.s32.totalorder %s373_s18, %s1065_s0  ;;  %p1068_p4 = scmp.lt.u32.totalorder %s373_s18, %s1537_s2 }
  0xb7   : > { %p1069_p5 = scmp.lt.u32.totalorder %s1336_s25, %s1065_s0  ;;  %p1071_p7 = scmp.lt.u32.totalorder %s1065_s0, %s373_s18 }
  0xb9   : > { %p1070_p6 = por %p1069_p5, %p1068_p4 }
  0xbb   : > { %p1072_p8 = por %p1071_p7, %p1070_p6 }
  0xbd   : > { %p1073_p10 = pnand %p1072_p8, %p1066_p3 }
  0xbf   : > { %1076 = shalt.err (!%p1073_p10)  }
  0xc0   : > { %s1077_s7 = scalar_lea.vmem %s1431_s1, 16  ;;  %p1082_p12 = scmp.lt.s32.totalorder %s1431_s1, %s1324_s27 }
  0xc1   : > { %p1078_p11 = scmp.ne.s32.totalorder %s1431_s1, %s1077_s7  ;;  %p1083_p0 = scmp.lt.s32.totalorder %s1345_s17, %s1077_s7 }
  0xc3   : > { %p1084_p1 = por %p1083_p0, %p1082_p12 }
  0xc5   : > { %p1085_p2 = pnand %p1084_p1, %p1078_p11 }
  0xc7   : > { %1088 = shalt.err (!%p1085_p2)  }
  0xc8   : > { %385 = dma.hbm_to_vmem [thread:$0]  %s373_s18, 16, %s1431_s1, [#allocation3] }
  0xc9   : > { %s814_s22 = sshll.u32 %s387_s28, 4 }
  0xca   : > { %s389_s29 = scalar_lea.hbm %s1537_s2, %s814_s22 }
  0xcb   : > { %s1089_s14 = scalar_lea.hbm %s389_s29, 16  ;;  %p1092_p4 = scmp.lt.u32.totalorder %s389_s29, %s1537_s2 }
  0xcc   : > { %p1090_p3 = scmp.ne.s32.totalorder %s389_s29, %s1089_s14  ;;  %p1093_p5 = scmp.lt.u32.totalorder %s1336_s25, %s1089_s14 }
  0xcd   : > { %p1095_p7 = scmp.lt.u32.totalorder %s1089_s14, %s389_s29 }
  0xce   : > { %p1094_p6 = por %p1093_p5, %p1092_p4 }
  0xd0   : > { %p1096_p8 = por %p1095_p7, %p1094_p6 }
  0xd2   : > { %p1097_p10 = pnand %p1096_p8, %p1090_p3 }
  0xd4   : > { %1100 = shalt.err (!%p1097_p10)  }
  0xd5   : > { %s1101_s10 = scalar_lea.vmem %s399_s24, 16  ;;  %p1106_p12 = scmp.lt.s32.totalorder %s399_s24, %s1324_s27 }
  0xd6   : > { %p1102_p11 = scmp.ne.s32.totalorder %s399_s24, %s1101_s10  ;;  %p1107_p0 = scmp.lt.s32.totalorder %s1345_s17, %s1101_s10 }
  0xd8   : > { %p1108_p1 = por %p1107_p0, %p1106_p12 }
  0xda   : > { %p1109_p2 = pnand %p1108_p1, %p1102_p11 }
  0xdc   : > { %1112 = shalt.err (!%p1109_p2)  }
  0xdd   : > { %401 = dma.hbm_to_vmem [thread:$0]  %s389_s29, 16, %s399_s24, [#allocation3] }
  0xde   : > { %s258_s1 = scalar_lea.vmem [#allocation6], %s1311_s20 }
  0xdf   : > { %1167 = dma.done.wait [#allocation3], 128 }
  0xe0   : > { %1168 = vsyncadd [#allocation3], 4294967168  ;;  %v1206_v0 = vmov 0   ;;  %v566_v1 = vld [vmem:[%s1322_s12] sm:$0xff]  ;;  %v1207_v2 = vmov 0.0   ;;  %v578_v4 = vlaneseq  ;;  %s835_s13 = sshll.u32 %s1187_s8, 7 }
  0xe1   : > { %906 = vset.pattern.permute.xlu0 %v1206_v0  ;;  %vm569_vm0 = vcmp.eq.s32.totalorder %v566_v1, 1  ;;  %v567_v6 = vld [vmem:[%s1539_s4] sm:$0x1]  ;;  %v568_v7 = vld [vmem:[%s1539_s4 + $0x1] sm:$0x1]  ;;  %s640_s11 = sshll.u32 %s258_s1, 4  ;;  %s1486_s11 = int_to_ptr.vmem [resolvable:$true] %s640_s11 }
  0xe2   : > { %v831_v3 = vsel %vm569_vm0, 1.0, %v1207_v2  ;;  %v579_v5 = vshrl.u32 %v578_v4, 7  ;;  %v572_v8 = vsub.f32 %v568_v7, %v567_v6  ;;  %v589_v11 = vld [vmem:[#allocation2] sm:$0xff]  ;;  %v598_v19 = vand.u32 127, %v578_v4  ;;  %s1564_s16 = sld [smem:[#allocation53_spill]]  ;;  %s1565_s29 = sand.u32 1, %s1179_s30  }
  0xe3   : > { %575 = vperm.xlu0 %906, %v831_v3   ;;  %v590_v12 = vld [vmem:[%s1538_s3] sm:$0xff]  ;;  %s626_s14 = scalar_lea.sflag [#allocation7], %s1565_s29  ;;  %s1113_s21 = scalar_lea.vmem %s1486_s11, 128 }
  0xe4   : > { %v580_v9 = vsub.s32 0, %v579_v5  ;;  %v591_v16 = vadd.f32 %v590_v12, %v589_v11  ;;  %vm599_vm1 = vcmp.lt.s32.totalorder %v598_v19, 32  ;;  %v832_v29 = vld [vmem:[%s1540_s5] ss:$0 sm:$0xff]  ;;  %p1114_p3 = scmp.ne.s32.totalorder %s1486_s11, %s1113_s21  ;;  %s1208_s8 = smov [#allocation6]  }
  0xe5   : > { %v833_v31 = vld [vmem:[%s1541_s6] ss:$0 sm:$0xff]  ;;  %s1117_s26 = sshll.u32 %s1208_s8, 4  ;;  %s1118_s26 = int_to_ptr.vmem [resolvable:$false] %s1117_s26 }
  0xe6   : > { %v581_v10 = vrot.slane %v572_v8, %v580_v9  ;;  %v586_v13 = vrot.slane %v567_v6, %v580_v9  ;;  %p1115_p4 = pnand %p1114_p3, %p1292_p9  ;;  %s1119_s10 = scalar_lea.vmem %s1118_s26, 256 }
  0xe7   : > { %p1120_p6 = scmp.lt.s32.totalorder %s1486_s11, %s1118_s26  ;;  %p1121_p7 = scmp.lt.s32.totalorder %s1119_s10, %s1113_s21 }
  0xe8   : > { %s1484_s19 = scalar_lea.hbm %s1564_s16, %s835_s13  ;;  %p1116_p5 = pneg %p1115_p4 }
  0xe9   : > { %p1122_p8 = por %p1121_p7, %p1120_p6 }
  0xeb   : > { %p1123_p10 = pnand %p1122_p8, %p1116_p5 }
 0x162   : > { %v576_v14 = vpop.permute.xlu0 %575 }
 0x163   : > { %v582_v15 = vmul.f32 %v581_v10, %v576_v14 }
 0x165   : > { %v587_v17 = vadd.f32 %v586_v13, %v582_v15 }
 0x167   : > { %v592_v18 = vadd.f32 %v591_v16, %v587_v17 }
 0x169   : > { %593 = vadd.xlane.f32.xlu0 %v592_v18 }
 0x1f6   : > { %v594_v20 = vpop.xlane.xlu0 %593 }
 0x1f7   : > { %v595_v21 = vmul.f32 0.03125, %v594_v20 }
 0x1f9   : > { %v596_v22 = vsub.f32 %v592_v18, %v595_v21 }
 0x1fb   : > { %v600_v23 = vsel %vm599_vm1, %v596_v22, 0.0 }
 0x1fc   : > { %v601_v24 = vmul.f32 %v600_v23, %v600_v23 }
 0x1fe   : > { %602 = vadd.xlane.f32.xlu1 %v601_v24 }
 0x28b   : > { %v603_v25 = vpop.xlane.xlu1 %602 }
 0x28c   : > { %v604_v26 = vmul.f32 0.03125, %v603_v25 }
 0x28e   : > { %v605_v27 = vadd.f32 1e-12, %v604_v26 }
 0x290   : > { %907 = vrsqrt.f32 %v605_v27 }
 0x29a   : > { %v908_v28 = vpop.eup %907 }
 0x29b   : > { %v607_v30 = vmul.f32 %v908_v28, %v600_v23 }
 0x29d   : > { %v615_v32 = vmul.f32 %v832_v29, %v607_v30 }
 0x29f   : > { %v623_v33 = vadd.f32 %v833_v31, %v615_v32 }
 0x2a1   : > { %624 = vst [vmem:[%s258_s1] sm:$0xff] %v623_v33 }
 0x2a2   : > { %1126 = shalt.err (!%p1123_p10)
}
 0x2a3   : > { %s1127_s20 = scalar_lea.hbm %s1484_s19, 128  ;;  %s1131_s25 = scalar_lea.hbm %s1564_s16, 256 }
 0x2a4   : > { %p1128_p11 = scmp.ne.s32.totalorder %s1484_s19, %s1127_s20  ;;  %p1132_p1 = scmp.lt.u32.totalorder %s1484_s19, %s1564_s16 }
 0x2a5   : > { %p1133_p2 = scmp.lt.u32.totalorder %s1131_s25, %s1127_s20  ;;  %p1135_p4 = scmp.lt.u32.totalorder %s1127_s20, %s1484_s19 }
 0x2a6   : > { %p1129_p12 = pnand %p1128_p11, %p1292_p9 }
 0x2a7   : > { %p1134_p3 = por %p1133_p2, %p1132_p1 }
 0x2a8   : > { %p1130_p0 = pneg %p1129_p12 }
 0x2a9   : > { %p1136_p5 = por %p1135_p4, %p1134_p3 }
 0x2ab   : > { %p1137_p6 = pnand %p1136_p5, %p1130_p0 }
 0x2ad   : > { %1140 = shalt.err (!%p1137_p6)
}
 0x2ae   : > { %840 = dma.vmem_to_hbm [thread:$0]  (%p1292_p9), %s1486_s11, 128, %s1484_s19, %s626_s14  }
 0x2af PF: > { %s1566_s9 = sld [smem:[#allocation48_spill]]  ;;  %s1567_s12 = sld [smem:[#allocation45_spill]] }
 0x2b5   : > { %p846_p7 = scmp.ge.s32.totalorder %s1566_s9, 2  ;;  %s652_s23 = sand.u32 1, %s1567_s12  }
 0x2b6   : > { %s653_s24 = scalar_lea.sflag [#allocation7], %s652_s23 }
 0x2b7   : > { %p843_p8 = pnand %p846_p7, %p1299_p13 }
 0x2b9   : > { %1170 = dma.done.wait (!%p843_p8), %s653_s24, 128  }
 0x2ba   : > { %1172 = vsyncadd (!%p843_p8), %s653_s24, 4294967168  ;;  %s26_s10 = sadd.s32 1, %s1566_s9   ;;  %s1569_s0 = sld [smem:[#allocation46_spill]] }
 0x2bb   : > { %p23_p10 = scmp.ge.s32.totalorder %s26_s10, 4   ;;  %s1570_s15 = sld [smem:[#allocation51_spill]] }
 0x2bc   : > { %s1571_s8 = sld [smem:[#allocation47_spill]]  ;;  %s1572_s9 = sld [smem:[#allocation49_spill]] }
 0x2bd   : > { %s1573_s29 = smov %s1179_s30  ;;  %25 = sbr.rel (!%p23_p10) target bundleno = 20 (0x14), region = 185 }
 0x2c0   : > { %s1574_s30 = smov %s1569_s0 }
 0x2c1   : > { %s1575_s0 = smov %s1570_s15 }
 0x2c4   :  { %658 = vsyncpa [#allocation7], 1 }
 0x2c5   :  { %660 = vsyncpa [#allocation7 + $0x1], 1 }
 0x2c6   :  { %661 = vsyncmov [#allocation3] }
 0x2c9   :  { %s662_s13 = vpop.sfrf %661 }
 0x2ca   :  { %p838_p9 = scmp.ne.s32.totalorder %s662_s13, 0 }
 0x2cc   :  { %666 = shalt.err (%p838_p9)  }
 0x2cd   :  { %668 = vsyncmov [#allocation3 + $0x1] }
 0x2d0   :  { %s669_s11 = vpop.sfrf %668 }
 0x2d1   :  { %p839_p13 = scmp.ne.s32.totalorder %s669_s11, 0 }
 0x2d3   :  { %673 = shalt.err (%p839_p13)  }

</bundles_post_ra>
